<compile_context>
chip_gen: v5e
topology: v5e:2x2
jax: 0.10.0
libtpu: 0.0.40
codegen_flags: <defaults>
</compile_context>

<pallas_src>
import math

import jax
import jax.numpy as jnp
from jax.experimental import pallas as pl
from jax.experimental.pallas import tpu as pltpu


# ---------------------------- fused Pallas kernel ----------------------------

def _make_kernel(R, use_mask):
    def kernel(*refs):
        if use_mask:
            h_ref, p_ref, f_ref, m_ref, w_ref, o_ref = refs
        else:
            h_ref, p_ref, f_ref, w_ref, o_ref = refs
            m_ref = None

        # Packed parameters (constant index_map -> fetched once, stays resident).
        w = w_ref[...]                                   # (R+3, H)
        wh = w[:R, :]                                    # (R, H)  h2att weight
        bh = w[R:R + 1, :].astype(jnp.float32)           # (1, H)  h2att bias
        wa = w[R + 1:R + 2, :].astype(jnp.float32)       # (1, H)  alpha_net weight
        ba = w[R + 2:R + 3, :1].astype(jnp.float32)      # (1, 1)  alpha_net bias

        # h2att on the MXU with a real M dimension (TB rows at once).
        att_h = jnp.dot(h_ref[...], wh,
                        preferred_element_type=jnp.float32) + bh          # (TB, H) f32

        # tanh(p_att_feats + att_h); p promoted on the fly (works for bf16 too).
        dot = jnp.tanh(p_ref[...] + att_h[:, None, :])                    # (TB, S, H) f32

        # alpha_net as broadcast-multiply + lane reduce over H (last axis).
        scores = jnp.sum(dot * wa, axis=-1) + ba                          # (TB, S) f32

        # Lane-dense softmax over S; divides via EUP approx reciprocal.
        smax = jnp.max(scores, axis=-1, keepdims=True)
        e = jnp.exp(scores - smax)
        weight = e * pl.reciprocal(jnp.sum(e, axis=-1, keepdims=True), approx=True)

        if use_mask:
            mask = m_ref[...].astype(jnp.float32)                         # (TB, S)
            weight = weight * mask
            weight = weight * pl.reciprocal(
                jnp.sum(weight, axis=-1, keepdims=True), approx=True)

        # Weighted sum of att_feats on the MXU: (TB,1,S) @ (TB,S,F) -> (TB,1,F).
        feats = f_ref[...]                                                # (TB, S, F)
        att = jnp.einsum('bqs,bsf->bqf',
                         weight[:, None, :].astype(feats.dtype), feats,
                         preferred_element_type=jnp.float32)
        o_ref[...] = att[:, 0, :].astype(o_ref.dtype)                     # (TB, F)

    return kernel


def _pick_tb(B, S, H, F):
    # Double-buffered big tiles (p_att_feats + att_feats), f32 upper bound.
    per_row = 2 * S * (H + F) * 4
    budget = 24 << 20                      # fits v5e/v6e/v7x scoped VMEM comfortably
    tb = max(1, budget // max(per_row, 1))
    if tb >= B:
        return B                           # single step: full-dim blocks
    return int(max(8, (tb // 8) * 8))      # multi-step: keep sublane dim 8-aligned


def attention_forward(h, att_feats, p_att_feats, params, att_masks=None):
    """Matches Attention.forward(h, att_feats, p_att_feats, att_masks)."""
    B = att_feats.shape[0]
    F = att_feats.shape[-1]
    att_size = att_feats.size // (B * F)      # same att_size calc as the PyTorch code
    H = params["w_h2att"].shape[1]
    R = h.shape[-1]
    S = att_size

    h2 = h.reshape(B, R)
    p3 = p_att_feats.reshape(B, S, H)
    feats3 = att_feats.reshape(B, S, F)

    use_mask = att_masks is not None
    mask2 = att_masks.reshape(B, S).astype(jnp.float32) if use_mask else None

    # Pack all tiny parameters into one (R+3, H) resident array.
    wdt = params["w_h2att"].dtype
    wpack = jnp.concatenate([
        params["w_h2att"].reshape(R, H).astype(wdt),
        params["b_h2att"].reshape(1, H).astype(wdt),
        params["w_alpha"].reshape(1, H).astype(wdt),
        jnp.full((1, H), params["b_alpha"].reshape(()), dtype=wdt),
    ], axis=0)

    TB = _pick_tb(B, S, H, F)
    n_steps = pl.cdiv(B, TB)
    if n_steps > 1 and n_steps % 2 == 1:
        n_steps += 1                          # even grid so both v7x TCs get work
    B_pad = n_steps * TB
    if B_pad != B:
        pad = B_pad - B
        h2 = jnp.pad(h2, ((0, pad), (0, 0)))
        p3 = jnp.pad(p3, ((0, pad), (0, 0), (0, 0)))
        feats3 = jnp.pad(feats3, ((0, pad), (0, 0), (0, 0)))
        if use_mask:
            mask2 = jnp.pad(mask2, ((0, pad), (0, 0)), constant_values=1.0)

    in_specs = [
        pl.BlockSpec((TB, R), lambda b: (b, 0)),            # h
        pl.BlockSpec((TB, S, H), lambda b: (b, 0, 0)),       # p_att_feats
        pl.BlockSpec((TB, S, F), lambda b: (b, 0, 0)),       # att_feats
    ]
    args = [h2, p3, feats3]
    if use_mask:
        in_specs.append(pl.BlockSpec((TB, S), lambda b: (b, 0)))   # mask (lane-dense)
        args.append(mask2)
    in_specs.append(pl.BlockSpec((R + 3, H), lambda b: (0, 0)))    # packed params
    args.append(wpack)

    # VMEM limit with headroom: double-buffered per-step tiles + resident weights.
    per_step = 2 * TB * (S * (H + F) + R + F + S) * 4
    vmem_limit = int(min(max(2 * (per_step + (R + 3) * H * 4), 16 << 20), 48 << 20))

    out = pl.pallas_call(
        _make_kernel(R, use_mask),
        out_shape=jax.ShapeDtypeStruct((B_pad, F), att_feats.dtype),
        grid=(n_steps,),
        in_specs=in_specs,
        out_specs=pl.BlockSpec((TB, F), lambda b: (b, 0)),
        compiler_params=pltpu.CompilerParams(
            dimension_semantics=("parallel",),
            vmem_limit_bytes=vmem_limit),
    )(*args)
    return out[:B]


# ---------------------------- parameter init ----------------------------

def init_params(key, rnn_size, att_hid_size):
    def lin(k, din, dout):
        k1, k2 = jax.random.split(k)
        bound = 1.0 / math.sqrt(din)
        w = jax.random.uniform(k1, (din, dout), jnp.float32, -bound, bound)
        b = jax.random.uniform(k2, (dout,), jnp.float32, -bound, bound)
        return w, b

    k1, k2 = jax.random.split(key)
    w_h2att, b_h2att = lin(k1, rnn_size, att_hid_size)    # h2att: Linear(rnn, att_hid)
    w_alpha, b_alpha = lin(k2, att_hid_size, 1)            # alpha_net: Linear(att_hid, 1)
    return dict(w_h2att=w_h2att, b_h2att=b_h2att,
                w_alpha=w_alpha, b_alpha=b_alpha)


# ---------------------------- main ----------------------------

if __name__ == "__main__":
    # batch=2, att_size (spatial)=16, rnn_size=32, att_hid_size=32, att_feat_size=32
    B, S, R, Hh, Fd = 2, 16, 32, 32, 32

    key = jax.random.PRNGKey(0)
    k_h, k_feats, k_p, k_params = jax.random.split(key, 4)

    h = jax.random.normal(k_h, (B, R), jnp.float32)
    att_feats = jax.random.normal(k_feats, (B, S, Fd), jnp.float32)
    p_att_feats = jax.random.normal(k_p, (B, S, Hh), jnp.float32)
    att_masks = jnp.ones((B, S), jnp.float32)
    att_masks = att_masks.at[1, 12:].set(0.0)   # pad out last 4 positions of batch 1

    params = init_params(k_params, rnn_size=R, att_hid_size=Hh)

    att_res = attention_forward(h, att_feats, p_att_feats, params, att_masks)
    jax.block_until_ready(att_res)

    assert att_res.shape == (B, Fd)
    assert bool(jnp.all(jnp.isfinite(att_res)))
    print("KERNEL_OK")
</pallas_src>

<mosaic_0001>
module attributes {stable_mosaic.version = 11 : i64} {
  func.func @kernel(%arg0: i32, %arg1: memref<2x32xf32, #tpu.memory_space<vmem>>, %arg2: memref<2x16x32xf32, #tpu.memory_space<vmem>>, %arg3: memref<2x16x32xf32, #tpu.memory_space<vmem>>, %arg4: memref<2x16xf32, #tpu.memory_space<vmem>>, %arg5: memref<35x32xf32, #tpu.memory_space<vmem>>, %arg6: memref<2x32xf32, #tpu.memory_space<vmem>>) attributes {dimension_semantics = [#tpu.dimension_semantics<parallel>], iteration_bounds = array<i64: 1>, scalar_prefetch = 0 : i64, scratch_operands = 0 : i64, tpu.core_type = #tpu.core_type<tc>, window_params = [{transform_indices = @transform_0, window_bounds = array<i64: 2, 32>}, {transform_indices = @transform_1, window_bounds = array<i64: 2, 16, 32>}, {transform_indices = @transform_2, window_bounds = array<i64: 2, 16, 32>}, {transform_indices = @transform_3, window_bounds = array<i64: 2, 16>}, {pipeline_mode = #tpu.pipeline_mode<synchronous>, transform_indices = @transform_4, window_bounds = array<i64: 35, 32>}, {transform_indices = @transform_5, window_bounds = array<i64: 2, 32>}]} {
    %c0 = arith.constant 0 : index
    %c0_0 = arith.constant 0 : index
    %0 = vector.load %arg5[%c0, %c0_0] : memref<35x32xf32, #tpu.memory_space<vmem>>, vector<35x32xf32>
    %1 = vector.extract_strided_slice %0 {offsets = [0, 0], sizes = [32, 32], strides = [1, 1]} : vector<35x32xf32> to vector<32x32xf32>
    %2 = vector.extract_strided_slice %0 {offsets = [32, 0], sizes = [1, 32], strides = [1, 1]} : vector<35x32xf32> to vector<1x32xf32>
    %3 = vector.extract_strided_slice %0 {offsets = [33, 0], sizes = [1, 32], strides = [1, 1]} : vector<35x32xf32> to vector<1x32xf32>
    %4 = vector.extract_strided_slice %0 {offsets = [34, 0], sizes = [1, 1], strides = [1, 1]} : vector<35x32xf32> to vector<1x1xf32>
    %c0_1 = arith.constant 0 : index
    %c0_2 = arith.constant 0 : index
    %5 = vector.load %arg1[%c0_1, %c0_2] : memref<2x32xf32, #tpu.memory_space<vmem>>, vector<2x32xf32>
    %cst = arith.constant dense<0.000000e+00> : vector<2x32xf32>
    %6 = tpu.matmul %5, %1, %cst {dimension_numbers = #tpu.dot_dimension_numbers<[1], [0], [0], [1], [0, 0, 1, 1], [], []>} : vector<2x32xf32>, vector<32x32xf32>, vector<2x32xf32> -> vector<2x32xf32>
    %7 = vector.broadcast %2 : vector<1x32xf32> to vector<2x32xf32>
    %8 = arith.addf %6, %7 : vector<2x32xf32>
    %c0_3 = arith.constant 0 : index
    %c0_4 = arith.constant 0 : index
    %c0_5 = arith.constant 0 : index
    %9 = vector.load %arg2[%c0_3, %c0_4, %c0_5] : memref<2x16x32xf32, #tpu.memory_space<vmem>>, vector<2x16x32xf32>
    %10 = vector.shape_cast %8 : vector<2x32xf32> to vector<2x1x32xf32>
    %11 = vector.broadcast %10 : vector<2x1x32xf32> to vector<2x16x32xf32>
    %12 = arith.addf %9, %11 : vector<2x16x32xf32>
    %13 = math.tanh %12 : vector<2x16x32xf32>
    %14 = vector.shape_cast %3 : vector<1x32xf32> to vector<1x1x32xf32>
    %15 = vector.broadcast %14 : vector<1x1x32xf32> to vector<2x16x32xf32>
    %16 = arith.mulf %13, %15 : vector<2x16x32xf32>
    %cst_6 = arith.constant dense<0.000000e+00> : vector<2x16xf32>
    %17 = vector.multi_reduction <add>, %16, %cst_6 [2] : vector<2x16x32xf32> to vector<2x16xf32>
    %18 = vector.broadcast %4 : vector<1x1xf32> to vector<2x16xf32>
    %19 = arith.addf %17, %18 : vector<2x16xf32>
    %cst_7 = arith.constant dense<0xFF800000> : vector<2xf32>
    %20 = vector.multi_reduction <maximumf>, %19, %cst_7 [1] : vector<2x16xf32> to vector<2xf32>
    %21 = vector.shape_cast %20 : vector<2xf32> to vector<2x1xf32>
    %22 = vector.broadcast %21 : vector<2x1xf32> to vector<2x16xf32>
    %23 = arith.subf %19, %22 : vector<2x16xf32>
    %24 = math.exp %23 : vector<2x16xf32>
    %cst_8 = arith.constant dense<0.000000e+00> : vector<2xf32>
    %25 = vector.multi_reduction <add>, %24, %cst_8 [1] : vector<2x16xf32> to vector<2xf32>
    %26 = vector.shape_cast %25 : vector<2xf32> to vector<2x1xf32>
    %27 = tpu.reciprocal %26 {approx = true} : vector<2x1xf32> -> vector<2x1xf32>
    %28 = vector.broadcast %27 : vector<2x1xf32> to vector<2x16xf32>
    %29 = arith.mulf %24, %28 : vector<2x16xf32>
    %c0_9 = arith.constant 0 : index
    %c0_10 = arith.constant 0 : index
    %30 = vector.load %arg4[%c0_9, %c0_10] : memref<2x16xf32, #tpu.memory_space<vmem>>, vector<2x16xf32>
    %31 = arith.mulf %29, %30 : vector<2x16xf32>
    %cst_11 = arith.constant dense<0.000000e+00> : vector<2xf32>
    %32 = vector.multi_reduction <add>, %31, %cst_11 [1] : vector<2x16xf32> to vector<2xf32>
    %33 = vector.shape_cast %32 : vector<2xf32> to vector<2x1xf32>
    %34 = tpu.reciprocal %33 {approx = true} : vector<2x1xf32> -> vector<2x1xf32>
    %35 = vector.broadcast %34 : vector<2x1xf32> to vector<2x16xf32>
    %36 = arith.mulf %31, %35 : vector<2x16xf32>
    %c0_12 = arith.constant 0 : index
    %c0_13 = arith.constant 0 : index
    %c0_14 = arith.constant 0 : index
    %37 = vector.load %arg3[%c0_12, %c0_13, %c0_14] : memref<2x16x32xf32, #tpu.memory_space<vmem>>, vector<2x16x32xf32>
    %38 = vector.shape_cast %36 : vector<2x16xf32> to vector<2x1x16xf32>
    "tpu.trace_start"() <{level = 10 : i32, message = "bqs,bsf->bqf"}> : () -> ()
    %cst_15 = arith.constant dense<0.000000e+00> : vector<2x1x32xf32>
    %39 = tpu.matmul %38, %37, %cst_15 {dimension_numbers = #tpu.dot_dimension_numbers<[2], [1], [1], [2], [0, 0, 0, 1, 1, 2], [0], [0]>} : vector<2x1x16xf32>, vector<2x16x32xf32>, vector<2x1x32xf32> -> vector<2x1x32xf32>
    "tpu.trace_stop"() : () -> ()
    %40 = vector.shape_cast %39 : vector<2x1x32xf32> to vector<2x32xf32>
    %c0_16 = arith.constant 0 : index
    %c0_17 = arith.constant 0 : index
    %41 = vector.load %arg6[%c0_16, %c0_17] : memref<2x32xf32, #tpu.memory_space<vmem>>, vector<2x32xf32>
    tpu.vector_store %arg6[%c0_16, %c0_17], %40 {strides = array<i32>} : memref<2x32xf32, #tpu.memory_space<vmem>>, vector<2x32xf32>,
    return
  }
  func.func @transform_0(%arg0: i32) -> (i32, i32) {
    %c0_i32 = arith.constant 0 : i32
    %c0_i32_0 = arith.constant 0 : i32
    return %arg0, %c0_i32 : i32, i32
  }
  func.func @transform_1(%arg0: i32) -> (i32, i32, i32) {
    %c0_i32 = arith.constant 0 : i32
    %c0_i32_0 = arith.constant 0 : i32
    %c0_i32_1 = arith.constant 0 : i32
    return %arg0, %c0_i32, %c0_i32_0 : i32, i32, i32
  }
  func.func @transform_2(%arg0: i32) -> (i32, i32, i32) {
    %c0_i32 = arith.constant 0 : i32
    %c0_i32_0 = arith.constant 0 : i32
    %c0_i32_1 = arith.constant 0 : i32
    return %arg0, %c0_i32, %c0_i32_0 : i32, i32, i32
  }
  func.func @transform_3(%arg0: i32) -> (i32, i32) {
    %c0_i32 = arith.constant 0 : i32
    %c0_i32_0 = arith.constant 0 : i32
    return %arg0, %c0_i32 : i32, i32
  }
  func.func @transform_4(%arg0: i32) -> (i32, i32) {
    %c0_i32 = arith.constant 0 : i32
    %c0_i32_0 = arith.constant 0 : i32
    %c0_i32_1 = arith.constant 0 : i32
    return %c0_i32, %c0_i32_0 : i32, i32
  }
  func.func @transform_5(%arg0: i32) -> (i32, i32) {
    %c0_i32 = arith.constant 0 : i32
    %c0_i32_0 = arith.constant 0 : i32
    return %arg0, %c0_i32 : i32, i32
  }
}

</mosaic_0001>

<bundles_post_ra>
// kernel: tpu_custom_call.1
= control target key start
LH: loop header
LB: loop body
LE: loop exit
PB: predicated region body
PF: predicated region fallthrough
CT: control target
= control target key end

     0   :  { %s520_s0 = inlined_call_operand.vmem [shape: f32[2,32], index: 0, kind: input, shape index: {}]   ;;  %s521_s1 = inlined_call_operand.vmem [shape: f32[2,16,32], index: 1, kind: input, shape index: {}]   ;;  %s522_s2 = inlined_call_operand.vmem [shape: f32[2,16,32], index: 2, kind: input, shape index: {}]   ;;  %s523_s3 = inlined_call_operand.vmem [shape: f32[2,16], index: 3, kind: input, shape index: {}]   ;;  %s524_s4 = inlined_call_operand.vmem [shape: f32[35,32], index: 4, kind: input, shape index: {}]   ;;  %s525_s5 = inlined_call_operand.hbm [shape: f32[2,32], index: 5, kind: output, shape index: {}]  }
   0x1   :  { %v24_v0 = vld [vmem:[%s524_s4 + $0x18] sm:$0xff]  ;;  %v23_v1 = vld [vmem:[%s524_s4 + $0x10] sm:$0xff]  ;;  %v22_v2 = vld [vmem:[%s524_s4 + $0x8] sm:$0xff] }
   0x2   :  { %44 = vmatpush.msra.mxu0 %v24_v0 }
   0x3   :  { %10 = vsyncpa [#allocation3], 0  ;;  %v21_v3 = vld [vmem:[%s524_s4] sm:$0xff]  ;;  %vm28_vm0 = vcmask 261120   ;;  %v53_v13 = vld [vmem:[%s521_s1 + $0x8] sm:$0xff]  ;;  %v100_v35 = vlaneseq  ;;  %vm105_vm1 = vcmask 130112  }
   0x4   :  { %45 = vmatpush.msra.mxu0 %v23_v1  ;;  %v26_v4 = vld [vmem:[%s520_s0] sm:$0x3]  ;;  %v54_v14 = vld [vmem:[%s521_s1 + $0x10] sm:$0xff]  ;;  %v55_v17 = vld [vmem:[%s521_s1 + $0x18] sm:$0xff]  ;;  %vm110_vm2 = vcmask 1041409   ;;  %vm113_vm3 = vcmask 123904  }
   0x5   :  { %v25_v5 = vld [vmem:[%s524_s4 + $0x20] sm:$0x7]  ;;  %v466_v37 = vand.u32 127, %v100_v35  ;;  %v399_v54 = vmov 0   ;;  %vm259_vm4 = vcmask 130048   ;;  %s329_s23 = sshll.u32 %s525_s5, 4  ;;  %s330_s23 = int_to_ptr.hbm [resolvable:$true] %s329_s23 }
   0x6   :  { %46 = vmatpush.msra.mxu0 %v22_v2  ;;  %v88_v6 = vrot.slane %v25_v5, 2  ;;  %v27_v7 = vperm.slane %v25_v5, 0  ;;  %v52_v10 = vld [vmem:[%s521_s1] sm:$0xff]  ;;  %v70_v21 = vperm.slane %v25_v5, 1  ;;  %347 = vset.pattern.permute.xlu1 %v399_v54  ;;  %vm320_vm5 = vcmask 254976  }
   0x7   :  { %v469_v39 = vadd.s32 4294967288, %v466_v37  ;;  %346 = vset.pattern.permute.xlu0 %v399_v54  ;;  %345 = vset.pattern.permute.xlu2 %v399_v54 }
   0x8   :  { %47 = vmatpush.msra.mxu0 %v21_v3  ;;  %341 = vpush %v88_v6  ;;  %v175_v6 = vshrl.u32 %v100_v35, 7 }
   0x9   :  { %338 = vmatmul.msk.f32.vlgmr.msra.gmra.mxu0 %vm28_vm0, %v26_v4 }
  0x39   :  { %s342_s1 = spop %341 }
  0x3a   :  { %v90_v38 = vstv %s342_s1 }
  0x86   :  { %v49_v8 = vpop.f32.mrf.mxu0 }
  0x87   :  { %v50_v9 = vadd.f32 %v49_v8, %v27_v7  ;;  %v171_v7 = vld [vmem:[%s523_s3] sm:$0x3] }
  0x88   :  { %v173_v8 = vperm.slane %v171_v7, 0 }
  0x89   :  { %v57_v11 = vrot.slane %v50_v9, 1  ;;  %v58_v12 = vperm.slane %v50_v9, 0  ;;  %v182_v9 = vadd.s32 8, %v175_v6 }
  0x8b   :  { %v59_v15 = vperm.slane %v57_v11, 0  ;;  %v62_v16 = vadd.f32 %v58_v12, %v52_v10  ;;  %v63_v18 = vadd.f32 %v58_v12, %v53_v13  ;;  %v186_v10 = vperm.slane %v171_v7, 1 }
  0x8d   :  { %v64_v19 = vadd.f32 %v59_v15, %v54_v14  ;;  %353 = vtanh.f32 %v62_v16  ;;  %v65_v20 = vadd.f32 %v59_v15, %v55_v17 }
  0x8f   :  { %355 = vtanh.f32 %v64_v19 }
  0x90   :  { %357 = vtanh.f32 %v63_v18 }
  0x91   :  { %359 = vtanh.f32 %v65_v20 }
  0x93   :  { %v354_v22 = vpop.eup %353 }
  0x94   :  { %v71_v23 = vmul.f32 %v354_v22, %v70_v21 }
  0x95   :  { %v356_v24 = vpop.eup %355 }
  0x96   :  { %v75_v25 = vsel %vm28_vm0, %v71_v23, 0.0  ;;  %v73_v26 = vmul.f32 %v356_v24, %v70_v21  ;;  %v358_v27 = vpop.eup %357 }
  0x97   :  { %76 = vadd.xlane.f32.xlu0 %v75_v25  ;;  %v360_v29 = vpop.eup %359  ;;  %v72_v30 = vmul.f32 %v358_v27, %v70_v21 }
  0x98   :  { %v81_v28 = vsel %vm28_vm0, %v73_v26, 0.0  ;;  %v74_v31 = vmul.f32 %v360_v29, %v70_v21 }
  0x99   :  { %82 = vadd.xlane.f32.xlu1 %v81_v28  ;;  %v78_v32 = vsel %vm28_vm0, %v72_v30, 0.0 }
  0x9a   :  { %v84_v33 = vsel %vm28_vm0, %v74_v31, 0.0 }
  0x9f   :  { %79 = vadd.xlane.f32.xlu0 %v78_v32 }
  0xa1   :  { %85 = vadd.xlane.f32.xlu1 %v84_v33 }
 0x10a   :  { %v77_v34 = vpop.xlane.xlu0 %76 }
 0x10b   :  { %v92_v41 = vadd.f32 %v90_v38, %v77_v34 }
 0x10c   :  { %v83_v36 = vpop.xlane.xlu1 %82 }
 0x10d   :  { %v94_v42 = vadd.f32 %v90_v38, %v83_v36  ;;  %v102_v47 = vperm.slane %v92_v41, %v466_v37 }
 0x10f   :  { %v107_v48 = vperm.slane %v94_v42, %v466_v37 }
 0x112   :  { %v80_v40 = vpop.xlane.xlu0 %79 }
 0x113   :  { %v93_v43 = vadd.f32 %v90_v38, %v80_v40 }
 0x114   :  { %v86_v44 = vpop.xlane.xlu1 %85 }
 0x115   :  { %v104_v45 = vperm.slane %v93_v43, %v469_v39  ;;  %v95_v46 = vadd.f32 %v90_v38, %v86_v44 }
 0x117   :  { %v108_v49 = vperm.slane %v95_v46, %v469_v39  ;;  %v106_v50 = vsel %vm105_vm1, %v104_v45, %v102_v47 }
 0x119   :  { %v109_v51 = vsel %vm105_vm1, %v108_v49, %v107_v48 }
 0x11a   :  { %v111_v52 = vsel %vm110_vm2, %v109_v51, %v106_v50 }
 0x11b   :  { %v114_v53 = vsel %vm113_vm3, %v111_v52, -inf }
 0x11c   :  { %115 = vmax.xlane.f32.xlu2 %v114_v53 }
 0x18f   :  { %v116_v55 = vpop.xlane.xlu2 %115 }
 0x190   :  { %v118_v56 = vperm.slane %v116_v55, 0  ;;  %v119_v57 = vperm.slane %v116_v55, 1 }
 0x192   :  { %v122_v58 = vsub.f32 %v92_v41, %v118_v56  ;;  %v123_v59 = vsub.f32 %v93_v43, %v118_v56  ;;  %v124_v60 = vsub.f32 %v94_v42, %v119_v57  ;;  %v125_v0 = vsub.f32 %v95_v46, %v119_v57 }
 0x194   :  { %v126_v61 = vmul.f32 1.442695, %v122_v58  ;;  %v128_v62 = vmul.f32 1.442695, %v123_v59  ;;  %v130_v63 = vmul.f32 1.442695, %v124_v60 }
 0x195   :  { %v132_v1 = vmul.f32 1.442695, %v125_v0  ;;  %v244_v0 = vld [vmem:[%s522_s2] sm:$0xff] }
 0x196   :  { %361 = vpow2.f32 %v126_v61  ;;  %v247_v61 = vld [vmem:[%s522_s2 + $0x18] sm:$0xff] }
 0x197   :  { %363 = vpow2.f32 %v128_v62  ;;  %v246_v62 = vld [vmem:[%s522_s2 + $0x10] sm:$0xff]  ;;  %309 = vmatpush.msra.mxu2 %v247_v61 }
 0x198   :  { %365 = vpow2.f32 %v130_v63  ;;  %v245_v63 = vld [vmem:[%s522_s2 + $0x8] sm:$0xff]  ;;  %s400_s2 = smov [#allocation2]  }
 0x199   :  { %367 = vpow2.f32 %v132_v1  ;;  %310 = vmatpush.msra.mxu2 %v246_v62  ;;  %276 = vmatpush.msra.mxu1 %v245_v63  ;;  %s327_s20 = sshll.u32 %s400_s2, 4  ;;  %s328_s20 = int_to_ptr.vmem [resolvable:$true] %s327_s20 }
 0x19b   :  { %277 = vmatpush.msra.mxu1 %v244_v0 }
 0x19c   :  { %v362_v2 = vpop.eup %361 }
 0x19d   :  { %v364_v3 = vpop.eup %363  ;;  %139 = vperm.xlu2 %345, %v362_v2  }
 0x19e   :  { %v366_v4 = vpop.eup %365  ;;  %142 = vperm.xlu0 %346, %v364_v3  }
 0x19f   :  { %145 = vperm.xlu1 %347, %v366_v4   ;;  %v368_v5 = vpop.eup %367 }
 0x1a5   :  { %148 = vperm.xlu2 %345, %v368_v5  }
 0x1a6   :  { %350 = vset.pattern.permute.xlu0 %v175_v6 }
 0x1a7   :  { %348 = vset.pattern.permute.xlu1 %v175_v6 }
 0x1ae   :  { %191 = vperm.xlu0 %350, %v186_v10  }
 0x1af   :  { %178 = vperm.xlu1 %348, %v173_v8  }
 0x1b6   :  { %352 = vset.pattern.permute.xlu0 %v399_v54 }
 0x1b7   :  { %349 = vset.pattern.permute.xlu1 %v182_v9 }
 0x1bf   :  { %184 = vperm.xlu1 %349, %v173_v8  }
 0x1c7   :  { %197 = vperm.xlu1 %349, %v186_v10  }
 0x1cf   :  { %351 = vset.pattern.permute.xlu1 %v399_v54 }
 0x1f7   :  { %v140_v11 = vpop.permute.xlu2 %139 }
 0x1f8   :  { %v150_v14 = vperm.slane %v140_v11, %v466_v37 }
 0x1ff   :  { %v149_v12 = vpop.permute.xlu2 %148 }
 0x200   :  { %v154_v17 = vperm.slane %v149_v12, %v469_v39 }
 0x210   :  { %v143_v13 = vpop.permute.xlu0 %142 }
 0x211   :  { %v146_v15 = vpop.permute.xlu1 %145  ;;  %v151_v16 = vperm.slane %v143_v13, %v469_v39 }
 0x212   :  { %v153_v18 = vperm.slane %v146_v15, %v466_v37 }
 0x213   :  { %v152_v19 = vsel %vm105_vm1, %v151_v16, %v150_v14 }
 0x214   :  { %v155_v20 = vsel %vm105_vm1, %v154_v17, %v153_v18 }
 0x215   :  { %v156_v21 = vsel %vm110_vm2, %v155_v20, %v152_v19 }
 0x216   :  { %v158_v22 = vsel %vm113_vm3, %v156_v21, 0.0 }
 0x217   :  { %159 = vadd.xlane.f32.xlu2 %v158_v22 }
 0x220   :  { %v192_v34 = vpop.permute.xlu0 %191 }
 0x221   :  { %v179_v24 = vpop.permute.xlu1 %178 }
 0x231   :  { %v185_v29 = vpop.permute.xlu1 %184 }
 0x239   :  { %v198_v38 = vpop.permute.xlu1 %197 }
 0x28a   :  { %v160_v23 = vpop.xlane.xlu2 %159 }
 0x28b   :  { %369 = vrcp.f32 %v160_v23 }
 0x291   :  { %v370_v25 = vpop.eup %369 }
 0x292   :  { %v163_v26 = vperm.slane %v370_v25, 0  ;;  %v164_v31 = vperm.slane %v370_v25, 1 }
 0x294   :  { %v168_v27 = vmul.f32 %v364_v3, %v163_v26  ;;  %v167_v28 = vmul.f32 %v362_v2, %v163_v26  ;;  %v169_v33 = vmul.f32 %v366_v4, %v164_v31  ;;  %v170_v36 = vmul.f32 %v368_v5, %v164_v31 }
 0x296   :  { %v204_v30 = vmul.f32 %v185_v29, %v168_v27  ;;  %v203_v32 = vmul.f32 %v179_v24, %v167_v28  ;;  %v205_v35 = vmul.f32 %v192_v34, %v169_v33  ;;  %v206_v40 = vmul.f32 %v198_v38, %v170_v36 }
 0x298   :  { %215 = vperm.xlu0 %352, %v204_v30   ;;  %212 = vperm.xlu1 %351, %v203_v32  }
 0x2a0   :  { %218 = vperm.xlu1 %351, %v205_v35  }
 0x2a8   :  { %221 = vperm.xlu1 %351, %v206_v40  }
 0x30a   :  { %v213_v41 = vpop.permute.xlu1 %212  ;;  %v216_v43 = vpop.permute.xlu0 %215 }
 0x30b   :  { %v224_v44 = vperm.slane %v216_v43, %v469_v39  ;;  %v223_v45 = vperm.slane %v213_v41, %v466_v37 }
 0x30d   :  { %v225_v49 = vsel %vm105_vm1, %v224_v44, %v223_v45 }
 0x312   :  { %v219_v42 = vpop.permute.xlu1 %218 }
 0x313   :  { %v226_v47 = vperm.slane %v219_v42, %v466_v37 }
 0x31a   :  { %v222_v46 = vpop.permute.xlu1 %221 }
 0x31b   :  { %v227_v48 = vperm.slane %v222_v46, %v469_v39 }
 0x31d   :  { %v228_v50 = vsel %vm105_vm1, %v227_v48, %v226_v47 }
 0x31e   :  { %v229_v51 = vsel %vm110_vm2, %v228_v50, %v225_v49 }
 0x31f   :  { %v231_v52 = vsel %vm113_vm3, %v229_v51, 0.0 }
 0x320   :  { %232 = vadd.xlane.f32.xlu2 %v231_v52 }
 0x393   :  { %v233_v53 = vpop.xlane.xlu2 %232 }
 0x394   :  { %371 = vrcp.f32 %v233_v53 }
 0x39a   :  { %v372_v54 = vpop.eup %371 }
 0x39b   :  { %v237_v55 = vperm.slane %v372_v54, 1  ;;  %v236_v56 = vperm.slane %v372_v54, 0 }
 0x39d   :  { %v243_v57 = vmul.f32 %v237_v55, %v206_v40  ;;  %v242_v58 = vmul.f32 %v237_v55, %v205_v35  ;;  %v240_v59 = vmul.f32 %v236_v56, %v203_v32  ;;  %v241_v60 = vmul.f32 %v236_v56, %v204_v30 }
 0x39f   :  { %288 = vperm.xlu1 %351, %v243_v57   ;;  %285 = vperm.xlu0 %352, %v242_v58  }
 0x3a0   :  { %251 = vperm.xlu2 %345, %v240_v59  }
 0x3a7   :  { %254 = vperm.xlu0 %352, %v241_v60  }
 0x3fa   :  { %v252_v6 = vpop.permute.xlu2 %251 }
 0x3fb   :  { %v256_v8 = vperm.slane %v252_v6, %v466_v37 }
 0x411   :  { %v289_v1 = vpop.permute.xlu1 %288  ;;  %v286_v2 = vpop.permute.xlu0 %285 }
 0x412   :  { %v291_v3 = vperm.slane %v289_v1, %v469_v39  ;;  %v290_v4 = vperm.slane %v286_v2, %v466_v37 }
 0x414   :  { %v292_v5 = vsel %vm105_vm1, %v291_v3, %v290_v4 }
 0x415   :  { %340 = vmatmul.msk.f32.vlgmr.msra.gmra.mxu2 %vm259_vm4, %v292_v5 }
 0x419   :  { %v255_v7 = vpop.permute.xlu0 %254 }
 0x41a   :  { %v257_v9 = vperm.slane %v255_v7, %v469_v39 }
 0x41c   :  { %v258_v10 = vsel %vm105_vm1, %v257_v9, %v256_v8 }
 0x41d   :  { %339 = vmatmul.msk.f32.vlgmr.msra.gmra.mxu1 %vm259_vm4, %v258_v10 }
 0x498   :  { %v312_v11 = vpop.f32.mrf.mxu2 }
 0x499   :  { %v317_v12 = vrot.slane %v312_v11, 7 }
 0x49a   :  { %v279_v13 = vpop.f32.mrf.mxu1 }
 0x49b   :  { %v318_v14 = vsel %vm110_vm2, %v317_v12, %v279_v13 }
 0x49c   :  { %321 = vst.msk [vmem:[#allocation2] sm:$0x3] %vm320_vm5, %v318_v14 }
 0x49d   :  { %332 = dma.vmem_to_hbm [thread:$0]  %s328_s20, 32, %s330_s23, [#allocation3]  }
 0x49e   :  { %397 = dma.done.wait [#allocation3], 32  }
 0x49f   :  { %398 = vsyncadd [#allocation3], 4294967264 }
 0x4a0   :  { %337 = vsyncpa [#allocation3], 1 }

</bundles_post_ra>
